<compile_context>
chip_gen: v6e
topology: v6e:2x2x1
jax: 0.10.0
libtpu: 0.0.40
codegen_flags: <defaults>
</compile_context>

<pallas_src>
import functools
import math

import jax
import jax.numpy as jnp
from jax import lax
from jax.experimental import pallas as pl
from jax.experimental.pallas import tpu as pltpu

_LANE = 128      # vreg lane width (last dim)
_SUBLANE = 8     # vreg sublane width (second-to-last dim)


def _round_up(v: int, m: int) -> int:
    return ((v + m - 1) // m) * m


# ----------------------------------------------------------------------------- kernel
def _fused_mlp_kernel(*refs, n_layers: int):
    """One batch tile through the whole Linear/GELU stack, VMEM-resident.

    refs = (x_ref, w0_ref, b0_ref, w1_ref, b1_ref, ..., o_ref)
    """
    x_ref = refs[0]
    o_ref = refs[-1]
    wb = refs[1:-1]

    inv_sqrt2 = jnp.float32(1.0 / math.sqrt(2.0))
    h = x_ref[...].astype(jnp.float32)
    for l in range(n_layers):                      # unrolled at trace time
        w = wb[2 * l][...]                         # (Kp, Np) compute dtype
        b = wb[2 * l + 1][...]                     # (1, Np)  f32
        # MXU matmul in the weights' dtype (bf16 by default), f32 accumulation.
        h = jnp.dot(h.astype(w.dtype), w, preferred_element_type=jnp.float32) + b
        if l < n_layers - 1:
            # exact GELU: 0.5*x*(1+erf(x/sqrt(2))) -- matches nn.GELU()
            # TODO(synk): tanh-approx GELU would move the polynomial to the EUP
            # slot (cheaper for wide hidden layers) but changes numerics.
            h = 0.5 * h * (1.0 + lax.erf(h * inv_sqrt2))
    o_ref[...] = h.astype(o_ref.dtype)


# ----------------------------------------------------------------------------- params
def prepare_mlp_params(params, compute_dtype=jnp.bfloat16):
    """Pad every Linear ONCE to lane multiples and cast weights to compute_dtype.

    params: list of (w, b) with w shaped (n_in, n_out) [already transposed].
    Returns (packed, dims, pdims); build once, reuse across forwards.
    """
    dims = [params[0][0].shape[0]] + [w.shape[1] for (w, _) in params]
    pdims = [_round_up(d, _LANE) for d in dims]
    packed = []
    for l, (w, b) in enumerate(params):
        kin, kout = w.shape
        kp, npad = pdims[l], pdims[l + 1]
        wp = jnp.zeros((kp, npad), compute_dtype).at[:kin, :kout].set(
            w.astype(compute_dtype))
        bp = jnp.zeros((1, npad), jnp.float32).at[0, :kout].set(
            b.astype(jnp.float32))
        packed.append((wp, bp))
    return packed, dims, pdims


# ----------------------------------------------------------------------------- policy
def _vmem_budget_bytes() -> int:
    """Generation-aware VMEM budget (~48 MiB on v7x, ~96 MiB on v5e/v6e)."""
    try:
        cap = pltpu.get_tpu_info().vmem_capacity_bytes
    except Exception:
        cap = 64 * 1024 * 1024          # conservative fallback (v7x-sized)
    return int(cap) * 3 // 4            # headroom for compiler temporaries


def _choose_batch_tile(M, pdims, weight_bytes, budget):
    """Pick the batch tile tm (multiple of 8) and padded batch Mp."""
    M8 = _round_up(M, _SUBLANE)
    # Per-row VMEM need: double-buffered x/out tiles + ~2 live f32 intermediates.
    row_bytes = 4 * (2 * (pdims[0] + pdims[-1]) + 2 * max(pdims))
    avail = max(budget - weight_bytes - (2 << 20), row_bytes * _SUBLANE)
    tm = min(1024, M8,
             max(_SUBLANE, (avail // row_bytes) // _SUBLANE * _SUBLANE))
    # v7x megacore: guarantee >=2 grid steps once there is enough batch to split
    # (no-op on 1-TC chips, just a smaller pipelined tile).
    if M8 > 128:
        tm = min(tm, _round_up((M8 + 1) // 2, _SUBLANE))
    # Cap padded-batch waste at ~12.5% for awkward batch sizes.
    while tm > _SUBLANE and (_round_up(M8, tm) - M8) * 8 > M8:
        tm = max(_SUBLANE, _round_up(tm // 2, _SUBLANE))
    return tm, _round_up(M8, tm)


# ----------------------------------------------------------------------------- forward
def mlp_forward(prepared, x):
    """Fused Pallas forward matching MLP.forward.

    prepared: output of prepare_mlp_params (padded/cast once, reused).
    x:        (M, layers[0]) f32
    """
    packed, dims, pdims = prepared
    M, K = x.shape
    assert K == dims[0], "input feature dim mismatch"
    n_layers = len(packed)

    weight_bytes = sum(w.size * w.dtype.itemsize + b.size * b.dtype.itemsize
                       for (w, b) in packed)
    budget = _vmem_budget_bytes()
    min_rows_bytes = 4 * _SUBLANE * (2 * (pdims[0] + pdims[-1]) + 2 * max(pdims))
    if weight_bytes + min_rows_bytes > budget:
        # TODO(synk): K/N-tiled fallback (f32 VMEM accumulator + pl.when
        # init/finalize, 256-wide tiles on v6e/v7x, 128 on v5e) for MLPs too
        # wide to keep VMEM-resident; not needed at this module's sizes.
        raise NotImplementedError("weights too large for VMEM-resident fused path")

    tm, Mp = _choose_batch_tile(M, pdims, weight_bytes, budget)

    # Only the activation is padded per call (weights were padded once).
    xp = jnp.zeros((Mp, pdims[0]), jnp.float32).at[:M, :K].set(
        x.astype(jnp.float32))

    operands = [xp]
    in_specs = [pl.BlockSpec((tm, pdims[0]), lambda i: (i, 0))]
    for (w, b) in packed:
        operands += [w, b]
        # Whole-array VMEM residents: copied once, no per-grid-step double buffer.
        in_specs += [pl.BlockSpec(memory_space=pltpu.MemorySpace.VMEM),
                     pl.BlockSpec(memory_space=pltpu.MemorySpace.VMEM)]

    # Cost estimate on REAL (unpadded) dims.
    flops = sum(2 * M * dims[l] * dims[l + 1] for l in range(n_layers))
    transcendentals = sum(M * dims[l + 1] for l in range(n_layers - 1))
    bytes_accessed = (4 * M * (dims[0] + dims[-1])
                      + sum(dims[l] * dims[l + 1] * packed[l][0].dtype.itemsize
                            + dims[l + 1] * 4 for l in range(n_layers)))

    out = pl.pallas_call(
        functools.partial(_fused_mlp_kernel, n_layers=n_layers),
        out_shape=jax.ShapeDtypeStruct((Mp, pdims[-1]), jnp.float32),
        grid=(Mp // tm,),
        in_specs=in_specs,
        out_specs=pl.BlockSpec((tm, pdims[-1]), lambda i: (i, 0)),
        compiler_params=pltpu.CompilerParams(
            dimension_semantics=("parallel",),   # shards batch across v7x's 2 TCs
            vmem_limit_bytes=budget,             # generation-aware scoped limit
        ),
        cost_estimate=pl.CostEstimate(
            flops=flops,
            transcendentals=transcendentals,
            bytes_accessed=bytes_accessed,
        ),
    )(*operands)

    # Strip batch/lane padding.
    return out[:M, :dims[-1]]


# ----------------------------------------------------------------------------- helpers
def init_mlp_params(key, layers):
    """Deterministic PyTorch-style (uniform +-1/sqrt(n_in)) init for each Linear."""
    params = []
    for n_in, n_out in zip(layers[:-1], layers[1:]):
        key, kw, kb = jax.random.split(key, 3)
        bound = 1.0 / math.sqrt(n_in)
        # stored already transposed: (n_in, n_out)
        w = jax.random.uniform(kw, (n_in, n_out), jnp.float32, -bound, bound)
        b = jax.random.uniform(kb, (n_out,), jnp.float32, -bound, bound)
        params.append((w, b))
    return params


def mlp_reference(params, x):
    """Pure-JAX reference (Linear -> exact GELU -> ... -> Linear), all f32."""
    n = len(params)
    for i, (w, b) in enumerate(params):
        x = x @ w + b
        if i < n - 1:
            x = jax.nn.gelu(x, approximate=False)
    return x


if __name__ == "__main__":
    layers = (16, 32, 64, 8)   # MLP(layers=(16, 32, 64, 8))

    key = jax.random.PRNGKey(0)
    key, kparams = jax.random.split(key)
    params = init_mlp_params(kparams, layers)

    # Pad/cast ONCE (the perf-review fix), reuse across every forward.
    prepared_f32 = prepare_mlp_params(params, compute_dtype=jnp.float32)
    prepared_bf16 = prepare_mlp_params(params, compute_dtype=jnp.bfloat16)

    for batch in (8, 260):   # single-tile case + multi-step grid / padding-strip case
        key, kx = jax.random.split(key)
        x = jax.random.normal(kx, (batch, layers[0]), jnp.float32)
        ref = mlp_reference(params, x)

        out32 = jax.block_until_ready(mlp_forward(prepared_f32, x))
        assert out32.shape == (batch, layers[-1])
        assert jnp.allclose(out32, ref, atol=1e-5, rtol=1e-5), "f32 mismatch vs reference"

        out16 = jax.block_until_ready(mlp_forward(prepared_bf16, x))
        assert out16.shape == (batch, layers[-1])
        assert jnp.allclose(out16, ref, atol=1e-1, rtol=1e-1), "bf16 mismatch vs reference"

    print("KERNEL_OK")
</pallas_src>

<mosaic_0001>
module attributes {stable_mosaic.version = 11 : i64} {
  func.func @_fused_mlp_kernel(%arg0: i32, %arg1: memref<8x128xf32, #tpu.memory_space<vmem>>, %arg2: memref<128x128xf32, #tpu.memory_space<vmem>>, %arg3: memref<1x128xf32, #tpu.memory_space<vmem>>, %arg4: memref<128x128xf32, #tpu.memory_space<vmem>>, %arg5: memref<1x128xf32, #tpu.memory_space<vmem>>, %arg6: memref<128x128xf32, #tpu.memory_space<vmem>>, %arg7: memref<1x128xf32, #tpu.memory_space<vmem>>, %arg8: memref<8x128xf32, #tpu.memory_space<vmem>>) attributes {dimension_semantics = [#tpu.dimension_semantics<parallel>], iteration_bounds = array<i64: 1>, scalar_prefetch = 0 : i64, scratch_operands = 0 : i64, tpu.core_type = #tpu.core_type<tc>, window_params = [{transform_indices = @transform_0, window_bounds = array<i64: 8, 128>}, {pipeline_mode = #tpu.pipeline_mode<synchronous>, transform_indices = @transform_1, window_bounds = array<i64: 128, 128>}, {pipeline_mode = #tpu.pipeline_mode<synchronous>, transform_indices = @transform_2, window_bounds = array<i64: 1, 128>}, {pipeline_mode = #tpu.pipeline_mode<synchronous>, transform_indices = @transform_3, window_bounds = array<i64: 128, 128>}, {pipeline_mode = #tpu.pipeline_mode<synchronous>, transform_indices = @transform_4, window_bounds = array<i64: 1, 128>}, {pipeline_mode = #tpu.pipeline_mode<synchronous>, transform_indices = @transform_5, window_bounds = array<i64: 128, 128>}, {pipeline_mode = #tpu.pipeline_mode<synchronous>, transform_indices = @transform_6, window_bounds = array<i64: 1, 128>}, {transform_indices = @transform_7, window_bounds = array<i64: 8, 128>}]} {
    %c0 = arith.constant 0 : index
    %c0_0 = arith.constant 0 : index
    %0 = vector.load %arg1[%c0, %c0_0] : memref<8x128xf32, #tpu.memory_space<vmem>>, vector<8x128xf32>
    %c0_1 = arith.constant 0 : index
    %c0_2 = arith.constant 0 : index
    %1 = vector.load %arg2[%c0_1, %c0_2] : memref<128x128xf32, #tpu.memory_space<vmem>>, vector<128x128xf32>
    %c0_3 = arith.constant 0 : index
    %c0_4 = arith.constant 0 : index
    %2 = vector.load %arg3[%c0_3, %c0_4] : memref<1x128xf32, #tpu.memory_space<vmem>>, vector<1x128xf32>
    %cst = arith.constant dense<0.000000e+00> : vector<8x128xf32>
    %3 = tpu.matmul %0, %1, %cst {dimension_numbers = #tpu.dot_dimension_numbers<[1], [0], [0], [1], [0, 0, 1, 1], [], []>} : vector<8x128xf32>, vector<128x128xf32>, vector<8x128xf32> -> vector<8x128xf32>
    %4 = vector.broadcast %2 : vector<1x128xf32> to vector<8x128xf32>
    %5 = arith.addf %3, %4 : vector<8x128xf32>
    %cst_5 = arith.constant 5.000000e-01 : f32
    %6 = vector.broadcast %cst_5 : f32 to vector<8x128xf32>
    %7 = arith.mulf %6, %5 : vector<8x128xf32>
    %cst_6 = arith.constant 0.707106769 : f32
    %8 = vector.broadcast %cst_6 : f32 to vector<8x128xf32>
    %9 = arith.mulf %5, %8 : vector<8x128xf32>
    %10 = math.erf %9 : vector<8x128xf32>
    %cst_7 = arith.constant 1.000000e+00 : f32
    %11 = vector.broadcast %cst_7 : f32 to vector<8x128xf32>
    %12 = arith.addf %11, %10 : vector<8x128xf32>
    %13 = arith.mulf %7, %12 : vector<8x128xf32>
    %c0_8 = arith.constant 0 : index
    %c0_9 = arith.constant 0 : index
    %14 = vector.load %arg4[%c0_8, %c0_9] : memref<128x128xf32, #tpu.memory_space<vmem>>, vector<128x128xf32>
    %c0_10 = arith.constant 0 : index
    %c0_11 = arith.constant 0 : index
    %15 = vector.load %arg5[%c0_10, %c0_11] : memref<1x128xf32, #tpu.memory_space<vmem>>, vector<1x128xf32>
    %cst_12 = arith.constant dense<0.000000e+00> : vector<8x128xf32>
    %16 = tpu.matmul %13, %14, %cst_12 {dimension_numbers = #tpu.dot_dimension_numbers<[1], [0], [0], [1], [0, 0, 1, 1], [], []>} : vector<8x128xf32>, vector<128x128xf32>, vector<8x128xf32> -> vector<8x128xf32>
    %17 = vector.broadcast %15 : vector<1x128xf32> to vector<8x128xf32>
    %18 = arith.addf %16, %17 : vector<8x128xf32>
    %cst_13 = arith.constant 5.000000e-01 : f32
    %19 = vector.broadcast %cst_13 : f32 to vector<8x128xf32>
    %20 = arith.mulf %19, %18 : vector<8x128xf32>
    %cst_14 = arith.constant 0.707106769 : f32
    %21 = vector.broadcast %cst_14 : f32 to vector<8x128xf32>
    %22 = arith.mulf %18, %21 : vector<8x128xf32>
    %23 = math.erf %22 : vector<8x128xf32>
    %cst_15 = arith.constant 1.000000e+00 : f32
    %24 = vector.broadcast %cst_15 : f32 to vector<8x128xf32>
    %25 = arith.addf %24, %23 : vector<8x128xf32>
    %26 = arith.mulf %20, %25 : vector<8x128xf32>
    %c0_16 = arith.constant 0 : index
    %c0_17 = arith.constant 0 : index
    %27 = vector.load %arg6[%c0_16, %c0_17] : memref<128x128xf32, #tpu.memory_space<vmem>>, vector<128x128xf32>
    %c0_18 = arith.constant 0 : index
    %c0_19 = arith.constant 0 : index
    %28 = vector.load %arg7[%c0_18, %c0_19] : memref<1x128xf32, #tpu.memory_space<vmem>>, vector<1x128xf32>
    %cst_20 = arith.constant dense<0.000000e+00> : vector<8x128xf32>
    %29 = tpu.matmul %26, %27, %cst_20 {dimension_numbers = #tpu.dot_dimension_numbers<[1], [0], [0], [1], [0, 0, 1, 1], [], []>} : vector<8x128xf32>, vector<128x128xf32>, vector<8x128xf32> -> vector<8x128xf32>
    %30 = vector.broadcast %28 : vector<1x128xf32> to vector<8x128xf32>
    %31 = arith.addf %29, %30 : vector<8x128xf32>
    %c0_21 = arith.constant 0 : index
    %c0_22 = arith.constant 0 : index
    %32 = vector.load %arg8[%c0_21, %c0_22] : memref<8x128xf32, #tpu.memory_space<vmem>>, vector<8x128xf32>
    tpu.vector_store %arg8[%c0_21, %c0_22], %31 {strides = array<i32>} : memref<8x128xf32, #tpu.memory_space<vmem>>, vector<8x128xf32>,
    return
  }
  func.func @transform_0(%arg0: i32) -> (i32, i32) {
    %c0_i32 = arith.constant 0 : i32
    %c0_i32_0 = arith.constant 0 : i32
    return %arg0, %c0_i32 : i32, i32
  }
  func.func @transform_1(%arg0: i32) -> (i32, i32) {
    %c0_i32 = arith.constant 0 : i32
    %c0_i32_0 = arith.constant 0 : i32
    %c0_i32_1 = arith.constant 0 : i32
    return %c0_i32, %c0_i32_0 : i32, i32
  }
  func.func @transform_2(%arg0: i32) -> (i32, i32) {
    %c0_i32 = arith.constant 0 : i32
    %c0_i32_0 = arith.constant 0 : i32
    %c0_i32_1 = arith.constant 0 : i32
    return %c0_i32, %c0_i32_0 : i32, i32
  }
  func.func @transform_3(%arg0: i32) -> (i32, i32) {
    %c0_i32 = arith.constant 0 : i32
    %c0_i32_0 = arith.constant 0 : i32
    %c0_i32_1 = arith.constant 0 : i32
    return %c0_i32, %c0_i32_0 : i32, i32
  }
  func.func @transform_4(%arg0: i32) -> (i32, i32) {
    %c0_i32 = arith.constant 0 : i32
    %c0_i32_0 = arith.constant 0 : i32
    %c0_i32_1 = arith.constant 0 : i32
    return %c0_i32, %c0_i32_0 : i32, i32
  }
  func.func @transform_5(%arg0: i32) -> (i32, i32) {
    %c0_i32 = arith.constant 0 : i32
    %c0_i32_0 = arith.constant 0 : i32
    %c0_i32_1 = arith.constant 0 : i32
    return %c0_i32, %c0_i32_0 : i32, i32
  }
  func.func @transform_6(%arg0: i32) -> (i32, i32) {
    %c0_i32 = arith.constant 0 : i32
    %c0_i32_0 = arith.constant 0 : i32
    %c0_i32_1 = arith.constant 0 : i32
    return %c0_i32, %c0_i32_0 : i32, i32
  }
  func.func @transform_7(%arg0: i32) -> (i32, i32) {
    %c0_i32 = arith.constant 0 : i32
    %c0_i32_0 = arith.constant 0 : i32
    return %arg0, %c0_i32 : i32, i32
  }
}

</mosaic_0001>

<bundles_post_ra>
// kernel: tpu_custom_call.1
= control target key start
LH: loop header
LB: loop body
LE: loop exit
PB: predicated region body
PF: predicated region fallthrough
CT: control target
= control target key end

     0   :  { %12 = vsyncpa [#allocation3], 0  ;;  %s804_s0 = inlined_call_operand.hbm [shape: f32[8,128], index: 0, kind: input, shape index: {}]   ;;  %s805_s1 = inlined_call_operand.hbm [shape: f32[128,128], index: 1, kind: input, shape index: {}]   ;;  %s806_s2 = inlined_call_operand.vmem [shape: f32[1,128], index: 2, kind: input, shape index: {}]   ;;  %s807_s3 = inlined_call_operand.hbm [shape: f32[128,128], index: 3, kind: input, shape index: {}]   ;;  %s808_s4 = inlined_call_operand.vmem [shape: f32[1,128], index: 4, kind: input, shape index: {}]   ;;  %s809_s5 = inlined_call_operand.hbm [shape: f32[128,128], index: 5, kind: input, shape index: {}]   ;;  %s810_s6 = inlined_call_operand.vmem [shape: f32[1,128], index: 6, kind: input, shape index: {}]   ;;  %s811_s7 = inlined_call_operand.hbm [shape: f32[8,128], index: 7, kind: output, shape index: {}]  }
   0x1   :  { %13 = vsyncpa [#allocation6], 0 }
   0x2   :  { %14 = vsyncpa [#allocation9], 0 }
   0x3   :  { %15 = vsyncpa [#allocation4], 0  ;;  %s668_s24 = smov [#allocation5]  }
   0x4   :  { %s31_s25 = sshll.u32 %s668_s24, 4  ;;  %s32_s25 = int_to_ptr.vmem [resolvable:$true] %s31_s25 }
   0x5   :  { %s568_s26 = scalar_lea.vmem %s32_s25, 2048  ;;  %p573_p1 = scmp.lt.s32.totalorder %s32_s25, %s32_s25 }
   0x6   :  { %p569_p0 = scmp.ne.s32.totalorder %s32_s25, %s568_s26  ;;  %p574_p2 = scmp.lt.s32.totalorder %s568_s26, %s568_s26 }
   0x8   :  { %p575_p3 = por %p574_p2, %p573_p1 }
   0xa   :  { %p576_p4 = pnand %p575_p3, %p569_p0 }
   0xc   :  { %579 = shalt.err (!%p576_p4)
}
   0xd   :  { %s669_s27 = smov 128   ;;  %s670_s28 = smov 8  }
   0xe   :  { %37 = dma.hbm_to_vmem [thread:$0]  %s805_s1, 2048, %s32_s25, [#allocation6], %s669_s27, %s669_s27, %s670_s28  }
   0xf   :  { %s671_s8 = smov [#allocation2]   ;;  %s672_s10 = smov [#allocation7]  }
  0x10   :  { %s22_s9 = sshll.u32 %s671_s8, 4  ;;  %s45_s11 = sshll.u32 %s672_s10, 4  ;;  %s23_s9 = int_to_ptr.vmem [resolvable:$true] %s22_s9  ;;  %s46_s11 = int_to_ptr.vmem [resolvable:$true] %s45_s11 }
  0x11   :  { %s588_s12 = scalar_lea.vmem %s23_s9, 128  ;;  %p593_p6 = scmp.lt.s32.totalorder %s23_s9, %s23_s9 }
  0x12   :  { %p589_p5 = scmp.ne.s32.totalorder %s23_s9, %s588_s12  ;;  %p594_p7 = scmp.lt.s32.totalorder %s588_s12, %s588_s12 }
  0x14   :  { %p595_p8 = por %p594_p7, %p593_p6 }
  0x16   :  { %p596_p9 = pnand %p595_p8, %p589_p5 }
  0x18   :  { %599 = shalt.err (!%p596_p9)
}
  0x19   :  { %25 = dma.hbm_to_vmem [thread:$0]  %s804_s0, 128, %s23_s9, [#allocation3]  }
  0x1a   :  { %s608_s15 = scalar_lea.vmem %s46_s11, 2048  ;;  %p613_p11 = scmp.lt.s32.totalorder %s46_s11, %s46_s11 }
  0x1b   :  { %p609_p10 = scmp.ne.s32.totalorder %s46_s11, %s608_s15  ;;  %p614_p12 = scmp.lt.s32.totalorder %s608_s15, %s608_s15 }
  0x1d   :  { %p615_p13 = por %p614_p12, %p613_p11 }
  0x1f   :  { %p616_p0 = pnand %p615_p13, %p609_p10 }
  0x21   :  { %619 = shalt.err (!%p616_p0)
}
  0x22   :  { %51 = dma.hbm_to_vmem [thread:$0]  %s807_s3, 2048, %s46_s11, [#allocation6], %s669_s27, %s669_s27, %s670_s28  }
  0x23   :  { %s673_s17 = smov [#allocation8]  }
  0x24   :  { %s59_s18 = sshll.u32 %s673_s17, 4  ;;  %s60_s18 = int_to_ptr.vmem [resolvable:$true] %s59_s18 }
  0x25   :  { %s628_s19 = scalar_lea.vmem %s60_s18, 2048  ;;  %p633_p2 = scmp.lt.s32.totalorder %s60_s18, %s60_s18 }
  0x26   :  { %p629_p1 = scmp.ne.s32.totalorder %s60_s18, %s628_s19  ;;  %p634_p3 = scmp.lt.s32.totalorder %s628_s19, %s628_s19 }
  0x28   :  { %p635_p4 = por %p634_p3, %p633_p2 }
  0x2a   :  { %p636_p5 = pnand %p635_p4, %p629_p1 }
  0x2c   :  { %639 = shalt.err (!%p636_p5)
}
  0x2d   :  { %65 = dma.hbm_to_vmem [thread:$0]  %s809_s5, 2048, %s60_s18, [#allocation9], %s669_s27, %s669_s27, %s670_s28  }
  0x2e   :  { %660 = dma.done.wait [#allocation3], 128  }
  0x2f   :  { %661 = vsyncadd [#allocation3], 4294967168 }
  0x30   :  { %662 = dma.done.wait [#allocation6], 4096  }
  0x31   :  { %663 = vsyncadd [#allocation6], 4294963200 }
  0x32   :  { %664 = dma.done.wait [#allocation9], 2048  }
  0x33   :  { %665 = vsyncadd [#allocation9], 4294965248  ;;  %v674_v0 = vmov 0.0   ;;  %vm675_vm0 = vmmov 0   ;;  %v96_v1 = vld [vmem:[#allocation5 + $0x78] sm:$0xff]  ;;  %v95_v2 = vld [vmem:[#allocation5 + $0x70] sm:$0xff] }
  0x34   :  { %442 = vmatprep.subr.mxu0 %v674_v0  ;;  %474 = vmatprep.mubr.msk.f32.mxu0 %vm675_vm0, %v674_v0  ;;  %v94_v3 = vld [vmem:[#allocation5 + $0x68] sm:$0xff]  ;;  %v93_v4 = vld [vmem:[#allocation5 + $0x60] sm:$0xff]  ;;  %v194_v5 = vld [vmem:[#allocation7 + $0x78] sm:$0xff]  ;;  %s676_s24 = smov [#allocation10]  }
  0x35   :  { %477 = vmatprep.subr.mxu1 %v674_v0  ;;  %509 = vmatprep.mubr.msk.f32.mxu1 %vm675_vm0, %v674_v0  ;;  %v92_v6 = vld [vmem:[#allocation5 + $0x58] sm:$0xff]  ;;  %v193_v7 = vld [vmem:[#allocation7 + $0x70] sm:$0xff]  ;;  %v192_v8 = vld [vmem:[#allocation7 + $0x68] sm:$0xff]  ;;  %s377_s25 = sshll.u32 %s676_s24, 4  ;;  %s378_s25 = int_to_ptr.vmem [resolvable:$true] %s377_s25 }
  0x36   :  { %443 = vmatpush3.msra.mxu0 %v96_v1  ;;  %478 = vmatpush3.msra.mxu1 %v194_v5  ;;  %v91_v9 = vld [vmem:[#allocation5 + $0x50] sm:$0xff]  ;;  %v191_v10 = vld [vmem:[#allocation7 + $0x60] sm:$0xff]  ;;  %v90_v11 = vld [vmem:[#allocation5 + $0x48] sm:$0xff]  ;;  %p645_p7 = scmp.lt.s32.totalorder %s378_s25, %s378_s25 }
  0x37   :  { %444 = vmatprep.subr.mxu0 %v674_v0  ;;  %479 = vmatprep.subr.mxu1 %v674_v0  ;;  %v89_v12 = vld [vmem:[#allocation5 + $0x40] sm:$0xff]  ;;  %v88_v13 = vld [vmem:[#allocation5 + $0x38] sm:$0xff]  ;;  %v87_v14 = vld [vmem:[#allocation5 + $0x30] sm:$0xff] }
  0x38   :  { %445 = vmatpush3.msra.mxu0 %v95_v2  ;;  %480 = vmatpush3.msra.mxu1 %v193_v7  ;;  %v86_v15 = vld [vmem:[#allocation5 + $0x28] sm:$0xff]  ;;  %v85_v16 = vld [vmem:[#allocation5 + $0x20] sm:$0xff]  ;;  %v84_v17 = vld [vmem:[#allocation5 + $0x18] sm:$0xff] }
  0x39   :  { %446 = vmatprep.subr.mxu0 %v674_v0  ;;  %481 = vmatprep.subr.mxu1 %v674_v0  ;;  %v83_v18 = vld [vmem:[#allocation5 + $0x10] sm:$0xff]  ;;  %v82_v19 = vld [vmem:[#allocation5 + $0x8] sm:$0xff]  ;;  %v81_v20 = vld [vmem:[#allocation5] sm:$0xff] }
  0x3a   :  { %447 = vmatpush3.msra.mxu0 %v94_v3  ;;  %482 = vmatpush3.msra.mxu1 %v192_v8  ;;  %v80_v21 = vld [vmem:[#allocation2] sm:$0xff]  ;;  %v189_v23 = vld [vmem:[#allocation7 + $0x50] sm:$0xff]  ;;  %v188_v24 = vld [vmem:[#allocation7 + $0x48] sm:$0xff] }
  0x3b   :  { %448 = vmatprep.subr.mxu0 %v674_v0  ;;  %483 = vmatprep.subr.mxu1 %v674_v0  ;;  %v190_v22 = vld [vmem:[#allocation7 + $0x58] sm:$0xff]  ;;  %v187_v25 = vld [vmem:[#allocation7 + $0x40] sm:$0xff]  ;;  %v185_v27 = vld [vmem:[#allocation7 + $0x30] sm:$0xff] }
  0x3c   :  { %449 = vmatpush3.msra.mxu0 %v93_v4  ;;  %484 = vmatpush3.msra.mxu1 %v191_v10  ;;  %v186_v26 = vld [vmem:[#allocation7 + $0x38] sm:$0xff]  ;;  %v184_v28 = vld [vmem:[#allocation7 + $0x28] sm:$0xff]  ;;  %v183_v29 = vld [vmem:[#allocation7 + $0x20] sm:$0xff] }
  0x3d   :  { %450 = vmatprep.subr.mxu0 %v674_v0  ;;  %485 = vmatprep.subr.mxu1 %v674_v0  ;;  %v182_v30 = vld [vmem:[#allocation7 + $0x18] sm:$0xff]  ;;  %v181_v31 = vld [vmem:[#allocation7 + $0x10] sm:$0xff]  ;;  %v180_v32 = vld [vmem:[#allocation7 + $0x8] sm:$0xff] }
  0x3e   :  { %451 = vmatpush3.msra.mxu0 %v92_v6  ;;  %486 = vmatpush3.msra.mxu1 %v190_v22  ;;  %v179_v33 = vld [vmem:[#allocation7] sm:$0xff]  ;;  %v292_v34 = vld [vmem:[#allocation8 + $0x78] sm:$0xff]  ;;  %v291_v35 = vld [vmem:[#allocation8 + $0x70] sm:$0xff] }
  0x3f   :  { %452 = vmatprep.subr.mxu0 %v674_v0  ;;  %487 = vmatprep.subr.mxu1 %v674_v0  ;;  %v290_v36 = vld [vmem:[#allocation8 + $0x68] sm:$0xff]  ;;  %v289_v37 = vld [vmem:[#allocation8 + $0x60] sm:$0xff]  ;;  %v388_v38 = vld [vmem:[%s806_s2] ss:$0 sm:$0xff] }
  0x40   :  { %453 = vmatpush3.msra.mxu0 %v91_v9  ;;  %488 = vmatpush3.msra.mxu1 %v189_v23  ;;  %v288_v47 = vld [vmem:[#allocation8 + $0x58] sm:$0xff]  ;;  %v287_v48 = vld [vmem:[#allocation8 + $0x50] sm:$0xff]  ;;  %v286_v49 = vld [vmem:[#allocation8 + $0x48] sm:$0xff] }
  0x41   :  { %454 = vmatprep.subr.mxu0 %v674_v0  ;;  %489 = vmatprep.subr.mxu1 %v674_v0  ;;  %v285_v50 = vld [vmem:[#allocation8 + $0x40] sm:$0xff]  ;;  %v284_v51 = vld [vmem:[#allocation8 + $0x38] sm:$0xff]  ;;  %v283_v52 = vld [vmem:[#allocation8 + $0x30] sm:$0xff] }
  0x42   :  { %455 = vmatpush3.msra.mxu0 %v90_v11  ;;  %490 = vmatpush3.msra.mxu1 %v188_v24  ;;  %v282_v53 = vld [vmem:[#allocation8 + $0x28] sm:$0xff]  ;;  %v281_v54 = vld [vmem:[#allocation8 + $0x20] sm:$0xff]  ;;  %v280_v55 = vld [vmem:[#allocation8 + $0x18] sm:$0xff] }
  0x43   :  { %456 = vmatprep.subr.mxu0 %v674_v0  ;;  %491 = vmatprep.subr.mxu1 %v674_v0  ;;  %v279_v56 = vld [vmem:[#allocation8 + $0x10] sm:$0xff]  ;;  %v278_v57 = vld [vmem:[#allocation8 + $0x8] sm:$0xff]  ;;  %v277_v58 = vld [vmem:[#allocation8] sm:$0xff] }
  0x44   :  { %457 = vmatpush3.msra.mxu0 %v89_v12  ;;  %492 = vmatpush3.msra.mxu1 %v187_v25  ;;  %v389_v59 = vld [vmem:[%s808_s4] ss:$0 sm:$0xff]  ;;  %s640_s4 = scalar_lea.vmem %s378_s25, 128 }
  0x45   :  { %458 = vmatprep.subr.mxu0 %v674_v0  ;;  %493 = vmatprep.subr.mxu1 %v674_v0  ;;  %p641_p6 = scmp.ne.s32.totalorder %s378_s25, %s640_s4  ;;  %p646_p8 = scmp.lt.s32.totalorder %s640_s4, %s640_s4 }
  0x46   :  { %459 = vmatpush3.msra.mxu0 %v88_v13  ;;  %494 = vmatpush3.msra.mxu1 %v186_v26 }
  0x47   :  { %460 = vmatprep.subr.mxu0 %v674_v0  ;;  %495 = vmatprep.subr.mxu1 %v674_v0  ;;  %p647_p9 = por %p646_p8, %p645_p7 }
  0x48   :  { %461 = vmatpush3.msra.mxu0 %v87_v14  ;;  %496 = vmatpush3.msra.mxu1 %v185_v27 }
  0x49   :  { %462 = vmatprep.subr.mxu0 %v674_v0  ;;  %497 = vmatprep.subr.mxu1 %v674_v0  ;;  %p648_p10 = pnand %p647_p9, %p641_p6 }
  0x4a   :  { %463 = vmatpush3.msra.mxu0 %v86_v15  ;;  %498 = vmatpush3.msra.mxu1 %v184_v28 }
  0x4b   :  { %464 = vmatprep.subr.mxu0 %v674_v0  ;;  %499 = vmatprep.subr.mxu1 %v674_v0 }
  0x4c   :  { %465 = vmatpush3.msra.mxu0 %v85_v16  ;;  %500 = vmatpush3.msra.mxu1 %v183_v29 }
  0x4d   :  { %466 = vmatprep.subr.mxu0 %v674_v0  ;;  %501 = vmatprep.subr.mxu1 %v674_v0 }
  0x4e   :  { %467 = vmatpush3.msra.mxu0 %v84_v17  ;;  %502 = vmatpush3.msra.mxu1 %v182_v30 }
  0x4f   :  { %468 = vmatprep.subr.mxu0 %v674_v0  ;;  %503 = vmatprep.subr.mxu1 %v674_v0 }
  0x50   :  { %469 = vmatpush3.msra.mxu0 %v83_v18  ;;  %504 = vmatpush3.msra.mxu1 %v181_v31 }
  0x51   :  { %470 = vmatprep.subr.mxu0 %v674_v0  ;;  %505 = vmatprep.subr.mxu1 %v674_v0 }
  0x52   :  { %471 = vmatpush3.msra.mxu0 %v82_v19  ;;  %506 = vmatpush3.msra.mxu1 %v180_v32 }
  0x53   :  { %472 = vmatprep.subr.mxu0 %v674_v0  ;;  %507 = vmatprep.subr.mxu1 %v674_v0 }
  0x54   :  { %473 = vmatpush3.msra.mxu0 %v81_v20  ;;  %508 = vmatpush3.msra.mxu1 %v179_v33 }
  0x55   :  { %475 = vmatmul.mubr.f32.vlgmr.msra.gmra.mxu0 %v80_v21  ;;  %512 = vmatprep.subr.mxu0 %v674_v0 }
  0x56   :  { %544 = vmatprep.mubr.msk.f32.mxu0 %vm675_vm0, %v674_v0  ;;  %513 = vmatpush3.msra.mxu0 %v292_v34 }
  0x57   :  { %514 = vmatprep.subr.mxu0 %v674_v0 }
  0x58   :  { %515 = vmatpush3.msra.mxu0 %v291_v35 }
  0x59   :  { %516 = vmatprep.subr.mxu0 %v674_v0 }
  0x5a   :  { %517 = vmatpush3.msra.mxu0 %v290_v36 }
  0x5b   :  { %518 = vmatprep.subr.mxu0 %v674_v0 }
  0x5c   :  { %519 = vmatpush3.msra.mxu0 %v289_v37 }
  0x5d   :  { %520 = vmatprep.subr.mxu0 %v674_v0 }
  0x5e   :  { %521 = vmatpush3.msra.mxu0 %v288_v47 }
  0x5f   :  { %522 = vmatprep.subr.mxu0 %v674_v0 }
  0x60   :  { %523 = vmatpush3.msra.mxu0 %v287_v48 }
  0x61   :  { %524 = vmatprep.subr.mxu0 %v674_v0 }
  0x62   :  { %525 = vmatpush3.msra.mxu0 %v286_v49 }
  0x63   :  { %526 = vmatprep.subr.mxu0 %v674_v0 }
  0x64   :  { %527 = vmatpush3.msra.mxu0 %v285_v50 }
  0x65   :  { %528 = vmatprep.subr.mxu0 %v674_v0 }
  0x66   :  { %529 = vmatpush3.msra.mxu0 %v284_v51 }
  0x67   :  { %530 = vmatprep.subr.mxu0 %v674_v0 }
  0x68   :  { %531 = vmatpush3.msra.mxu0 %v283_v52 }
  0x69   :  { %532 = vmatprep.subr.mxu0 %v674_v0 }
  0x6a   :  { %533 = vmatpush3.msra.mxu0 %v282_v53 }
  0x6b   :  { %534 = vmatprep.subr.mxu0 %v674_v0 }
  0x6c   :  { %535 = vmatpush3.msra.mxu0 %v281_v54 }
  0x6d   :  { %536 = vmatprep.subr.mxu0 %v674_v0 }
  0x6e   :  { %537 = vmatpush3.msra.mxu0 %v280_v55 }
  0x6f   :  { %538 = vmatprep.subr.mxu0 %v674_v0 }
  0x70   :  { %539 = vmatpush3.msra.mxu0 %v279_v56 }
  0x71   :  { %540 = vmatprep.subr.mxu0 %v674_v0 }
  0x72   :  { %541 = vmatpush3.msra.mxu0 %v278_v57 }
  0x73   :  { %542 = vmatprep.subr.mxu0 %v674_v0  ;;  %v390_v0 = vld [vmem:[%s810_s6] ss:$0 sm:$0xff] }
  0x74   :  { %543 = vmatpush3.msra.mxu0 %v277_v58 }
 0x115   :  { %v170_v39 = vpop.f32.mrf.mxu0 }
 0x116   :  { %v171_v40 = vadd.f32 %v388_v38, %v170_v39 }
 0x117   :  { %v476_v41 = vpop.f32.mrf.mxu0 }
 0x118   :  { %v175_v42 = vmul.f32 0.70710677, %v171_v40  ;;  %v174_v44 = vmul.f32 0.5, %v171_v40 }
 0x11a   :  { %556 = verf.f32 %v175_v42 }
 0x127   :  { %v557_v43 = vpop.eup %556 }
 0x128   :  { %v177_v45 = vadd.f32 1.0, %v557_v43 }
 0x12a   :  { %v178_v46 = vmul.f32 %v177_v45, %v174_v44 }
 0x12c   :  { %510 = vmatmul.mubr.f32.vlgmr.msra.gmra.mxu1 %v178_v46 }
 0x1ec   :  { %v268_v60 = vpop.f32.mrf.mxu1 }
 0x1ed   :  { %v269_v61 = vadd.f32 %v389_v59, %v268_v60 }
 0x1ee   :  { %v511_v62 = vpop.f32.mrf.mxu1 }
 0x1ef   :  { %v273_v63 = vmul.f32 0.70710677, %v269_v61  ;;  %v272_v2 = vmul.f32 0.5, %v269_v61 }
 0x1f1   :  { %558 = verf.f32 %v273_v63 }
 0x1fe   :  { %v559_v1 = vpop.eup %558 }
 0x1ff   :  { %v275_v3 = vadd.f32 1.0, %v559_v1 }
 0x201   :  { %v276_v4 = vmul.f32 %v275_v3, %v272_v2 }
 0x203   :  { %545 = vmatmul.mubr.f32.vlgmr.msra.gmra.mxu0 %v276_v4 }
 0x2c3   :  { %v366_v5 = vpop.f32.mrf.mxu0 }
 0x2c4   :  { %v367_v6 = vadd.f32 %v390_v0, %v366_v5 }
 0x2c5   :  { %v546_v7 = vpop.f32.mrf.mxu0 }
 0x2c6   :  { %370 = vst [vmem:[#allocation10] sm:$0xff] %v367_v6 }
 0x2c7   :  { %651 = shalt.err (!%p648_p10)
}
 0x2c8   :  { %380 = dma.vmem_to_hbm [thread:$0]  %s378_s25, 128, %s811_s7, [#allocation4]  }
 0x2c9   :  { %666 = dma.done.wait [#allocation4], 128  }
 0x2ca   :  { %667 = vsyncadd [#allocation4], 4294967168 }
 0x2cb   :  { %384 = vsyncpa [#allocation3], 1 }
 0x2cc   :  { %385 = vsyncpa [#allocation6], 1 }
 0x2cd   :  { %386 = vsyncpa [#allocation9], 1 }
 0x2ce   :  { %387 = vsyncpa [#allocation4], 1 }

</bundles_post_ra>
